<compile_context>
chip_gen: v6e
topology: v6e:2x2x1
jax: 0.10.0
libtpu: 0.0.40
codegen_flags: <defaults>
</compile_context>

<pallas_src>
import functools

import jax
import jax.numpy as jnp
from jax import lax
from jax.experimental import pallas as pl
from jax.experimental.pallas import tpu as pltpu

LANES = 128
SUBLANES = 8


def _round_up(x, m):
    return ((x + m - 1) // m) * m


def _default_num_core_splits():
    # 2 TensorCores per chip only on v7x-class parts; v5e/v6e are 1 TC/chip.
    try:
        kind = jax.devices()[0].device_kind.lower()
    except Exception:
        return 1
    return 2 if ("v7" in kind or "7x" in kind) else 1


def _alpha_loss_kernel(x_ref, t_ref, out_ref, acc_ref, *, alpha, gamma,
                       full_rows, tile_rows, chunk_rows, tiles_per_core):
    i = pl.program_id(0)          # core-split axis ("parallel")
    j = pl.program_id(1)          # tiles within this core ("arbitrary")
    nj = pl.num_programs(1)

    @pl.when(j == 0)
    def _():
        acc_ref[...] = jnp.zeros_like(acc_ref)

    base_row = (i * tiles_per_core + j) * tile_rows

    def chunk_loss(row0):
        # Static slice (free view) of the current tile.
        x = x_ref[row0:row0 + chunk_rows, :].astype(jnp.float32)
        t = t_ref[row0:row0 + chunk_rows, :].astype(jnp.float32)

        # Numerically stable BCE-with-logits:
        #   bce = relu(x) - x*t + log1p(exp(-|x|))
        e = jnp.exp(-jnp.abs(x))
        xt_minus_relu = x * t - jnp.maximum(x, 0.0)      # always <= 0
        bce = jnp.log1p(e) - xt_minus_relu

        # pt = exp(-bce): reuses bce, no f32 vector divide (perf review).
        pt = jnp.exp(-bce)
        omp = 1.0 - pt

        g = float(gamma)
        if g == 2.0:                                      # common case: no pow
            focal = omp * omp
        elif g == 1.0:
            focal = omp
        elif g == 0.0:
            focal = jnp.ones_like(omp)
        elif g.is_integer() and 0.0 < g <= 8.0:
            focal = omp
            for _ in range(int(g) - 1):
                focal = focal * omp
        else:
            focal = jnp.power(omp, jnp.float32(g))

        # Folded alpha weight: t*a + (1-t)*(1-a) == (1-a) + t*(2a-1).
        alpha_w = (1.0 - alpha) + t * (2.0 * alpha - 1.0)
        return alpha_w * (focal * bce)

    num_chunks = tile_rows // chunk_rows

    def accumulate(masked):
        # Unrolled at trace time; each chunk keeps intermediates small and
        # feeds a cheap VPU reduction into the (8,128) accumulator.
        for c in range(num_chunks):
            row0 = c * chunk_rows
            loss = chunk_loss(row0)
            if masked:
                row_ids = (base_row + row0
                           + lax.broadcasted_iota(jnp.int32, loss.shape, 0))
                loss = jnp.where(row_ids < full_rows, loss, 0.0)
            acc_ref[...] += jnp.sum(
                loss.reshape(chunk_rows // SUBLANES, SUBLANES, LANES), axis=0)

    # Only boundary / duplicated tiles pay for the iota+compare+select mask.
    interior = base_row + tile_rows <= full_rows

    @pl.when(interior)
    def _():
        accumulate(masked=False)

    @pl.when(jnp.logical_not(interior))
    def _():
        accumulate(masked=True)

    @pl.when(j == nj - 1)
    def _():
        out_ref[0, 0] = jnp.sum(acc_ref[...])


def _alpha_loss_elems(x, t, alpha, gamma):
    """Pure-JAX per-element loss (reference math; also used for the <128 tail)."""
    x = x.astype(jnp.float32)
    t = t.astype(jnp.float32)
    bce = jnp.maximum(x, 0.0) - x * t + jnp.log1p(jnp.exp(-jnp.abs(x)))
    pt = jnp.exp(-bce)
    f_loss = (1.0 - pt) ** gamma * bce
    aw = t * alpha + (1.0 - t) * (1.0 - alpha)
    return aw * f_loss


def alpha_loss(inputs, targets, *, alpha=0.5, gamma=2.0, logits=True,
               reduction="mean", tile_rows=4096, chunk_rows=512,
               num_core_splits=None):
    """Alpha-weighted focal loss (AlphaLoss.forward) for logits=True."""
    if not logits:
        # TODO(synk): logits=False (binary_cross_entropy on probabilities) not implemented.
        raise NotImplementedError("only logits=True is implemented")
    assert inputs.shape == targets.shape

    n = int(inputs.size)
    if n == 0:
        if reduction == "sum":
            return jnp.float32(0.0)
        if reduction == "mean":
            return jnp.float32(jnp.nan)   # torch.mean(empty) -> nan
        raise NotImplementedError("reduction must be 'mean' or 'sum'")

    x_flat = jnp.ravel(inputs)
    t_flat = jnp.ravel(targets)
    rem = n % LANES
    full_rows = n // LANES
    body_n = full_rows * LANES

    total = jnp.float32(0.0)

    if full_rows > 0:
        # Lane-aligned body. When n % 128 == 0 this is a zero-copy reshape
        # (no jnp.pad full-array copy); otherwise only the body is sliced.
        x2 = x_flat[:body_n].reshape(full_rows, LANES)
        t2 = t_flat[:body_n].reshape(full_rows, LANES)

        # Tile / chunk sizing: big lane-dense DMA blocks, small compute chunks.
        chunk_rows = max(SUBLANES,
                         min(int(chunk_rows), _round_up(full_rows, SUBLANES)))
        chunk_rows = _round_up(chunk_rows, SUBLANES)
        tile_rows = max(chunk_rows,
                        min(int(tile_rows), _round_up(full_rows, chunk_rows)))
        tile_rows = _round_up(tile_rows, chunk_rows)

        n_tiles = pl.cdiv(full_rows, tile_rows)
        splits = (num_core_splits if num_core_splits is not None
                  else _default_num_core_splits())
        splits = max(1, min(int(splits), n_tiles))
        tiles_per_core = pl.cdiv(n_tiles, splits)

        kernel = functools.partial(
            _alpha_loss_kernel,
            alpha=float(alpha), gamma=float(gamma),
            full_rows=full_rows, tile_rows=tile_rows, chunk_rows=chunk_rows,
            tiles_per_core=tiles_per_core)

        # Clamp the block index so the DMA never targets a fully out-of-range
        # block (duplicated data is zeroed by the in-kernel mask).
        def in_map(i, j):
            return (jnp.minimum(i * tiles_per_core + j, n_tiles - 1), 0)

        in_spec = pl.BlockSpec((tile_rows, LANES), in_map)

        bytes_accessed = int(x2.size * x2.dtype.itemsize
                             + t2.size * t2.dtype.itemsize + splits * 4)
        cost = pl.CostEstimate(flops=20 * body_n,
                               transcendentals=3 * body_n,
                               bytes_accessed=bytes_accessed)

        partials = pl.pallas_call(
            kernel,
            out_shape=jax.ShapeDtypeStruct((splits, 1), jnp.float32),
            grid_spec=pltpu.PrefetchScalarGridSpec(
                num_scalar_prefetch=0,
                grid=(splits, tiles_per_core),
                in_specs=[in_spec, in_spec],
                out_specs=pl.BlockSpec((1, 1), lambda i, j: (i, 0),
                                       memory_space=pltpu.SMEM),
                scratch_shapes=[pltpu.VMEM((SUBLANES, LANES), jnp.float32)],
            ),
            compiler_params=pltpu.CompilerParams(
                dimension_semantics=("parallel", "arbitrary"),
                vmem_limit_bytes=32 * 1024 * 1024),
            cost_estimate=cost,
        )(x2, t2)
        total = total + jnp.sum(partials)

    if rem:
        # <128-element ragged tail: tiny wrapper-side computation (no pad copy).
        total = total + jnp.sum(
            _alpha_loss_elems(x_flat[body_n:], t_flat[body_n:], alpha, gamma))

    if reduction == "mean":
        return total * jnp.float32(1.0 / n)
    if reduction == "sum":
        return total
    # TODO(synk): reduction='none' (per-element output) not implemented in the Pallas path.
    raise NotImplementedError("reduction must be 'mean' or 'sum'")


def alpha_loss_ref(inputs, targets, alpha=0.5, gamma=2.0):
    """Pure-JAX reference matching the PyTorch AlphaLoss (logits=True, mean)."""
    return jnp.mean(_alpha_loss_elems(inputs, targets, alpha, gamma))


if __name__ == "__main__":
    key = jax.random.PRNGKey(0)
    k1, k2, k3, k4 = jax.random.split(key, 4)

    # Test 1: NCHW, batch=2, channels=4, spatial=16x16 (numel % 128 == 0).
    x = jax.random.normal(k1, (2, 4, 16, 16), dtype=jnp.float32)
    # bf16 is lossless for hard 0/1 labels and halves the target HBM stream.
    targets = (jax.random.uniform(k2, (2, 4, 16, 16)) > 0.5).astype(jnp.bfloat16)
    out = jax.block_until_ready(
        alpha_loss(x, targets, alpha=0.5, gamma=2.0, reduction="mean"))
    ref = alpha_loss_ref(x, targets, alpha=0.5, gamma=2.0)
    assert jnp.allclose(out, ref, rtol=2e-5, atol=2e-6), (out, ref)

    # Test 2: ragged size (exercises boundary-masked tiles + wrapper tail),
    # soft f32 targets, small explicit tiles to force a multi-tile grid.
    x2 = jax.random.normal(k3, (1816,), dtype=jnp.float32)
    t2 = jax.random.uniform(k4, (1816,), dtype=jnp.float32)
    out2 = jax.block_until_ready(
        alpha_loss(x2, t2, alpha=0.25, gamma=2.0, reduction="mean",
                   tile_rows=8, chunk_rows=8))
    ref2 = alpha_loss_ref(x2, t2, alpha=0.25, gamma=2.0)
    assert jnp.allclose(out2, ref2, rtol=2e-5, atol=2e-6), (out2, ref2)

    print("KERNEL_OK")
</pallas_src>

<mosaic_0001>
module attributes {stable_mosaic.version = 11 : i64} {
  func.func @_alpha_loss_kernel(%arg0: i32, %arg1: i32, %arg2: memref<16x128xf32, #tpu.memory_space<vmem>>, %arg3: memref<16x128xbf16, #tpu.memory_space<vmem>>, %arg4: memref<1x1xf32, #tpu.memory_space<smem>>, %arg5: memref<8x128xf32, #tpu.memory_space<vmem>>) attributes {dimension_semantics = [#tpu.dimension_semantics<parallel>, #tpu.dimension_semantics<arbitrary>], iteration_bounds = array<i64: 1, 1>, scalar_prefetch = 0 : i64, scratch_operands = 1 : i64, tpu.core_type = #tpu.core_type<tc>, window_params = [{transform_indices = @transform_0, window_bounds = array<i64: 16, 128>}, {transform_indices = @transform_1, window_bounds = array<i64: 16, 128>}, {transform_indices = @transform_2, window_bounds = array<i64: 1, 1>}]} {
    %c0_i32 = arith.constant 0 : i32
    %0 = arith.cmpi eq, %arg1, %c0_i32 : i32
    %1 = arith.extui %0 : i1 to i32
    %c0_i32_0 = arith.constant 0 : i32
    %2 = arith.cmpi ne, %1, %c0_i32_0 : i32
    scf.if %2 {
      %cst = arith.constant 0.000000e+00 : f32
      %16 = vector.broadcast %cst : f32 to vector<8x128xf32>
      %c0 = arith.constant 0 : index
      %c0_7 = arith.constant 0 : index
      %17 = vector.load %arg5[%c0, %c0_7] : memref<8x128xf32, #tpu.memory_space<vmem>>, vector<8x128xf32>
      tpu.vector_store %arg5[%c0, %c0_7], %16 {strides = array<i32>} : memref<8x128xf32, #tpu.memory_space<vmem>>, vector<8x128xf32>,
    } else {
    }
    %c1_i32 = arith.constant 1 : i32
    %3 = arith.muli %arg0, %c1_i32 : i32
    %4 = arith.addi %3, %arg1 : i32
    %c16_i32 = arith.constant 16 : i32
    %5 = arith.muli %4, %c16_i32 : i32
    %c16_i32_1 = arith.constant 16 : i32
    %6 = arith.addi %5, %c16_i32_1 : i32
    %c16_i32_2 = arith.constant 16 : i32
    %7 = arith.cmpi sle, %6, %c16_i32_2 : i32
    %8 = arith.extui %7 : i1 to i32
    %c0_i32_3 = arith.constant 0 : i32
    %9 = arith.cmpi ne, %8, %c0_i32_3 : i32
    scf.if %9 {
      %c0 = arith.constant 0 : index
      %c0_7 = arith.constant 0 : index
      %16 = vector.load %arg2[%c0, %c0_7] : memref<16x128xf32, #tpu.memory_space<vmem>>, vector<16x128xf32>
      %c0_8 = arith.constant 0 : index
      %c0_9 = arith.constant 0 : index
      %17 = vector.load %arg3[%c0_8, %c0_9] : memref<16x128xbf16, #tpu.memory_space<vmem>>, vector<16x128xbf16>
      %18 = arith.extf %17 : vector<16x128xbf16> to vector<16x128xf32>
      %19 = math.absf %16 : vector<16x128xf32>
      %cst = arith.constant 0.000000e+00 : f32
      %20 = vector.broadcast %cst : f32 to vector<16x128xf32>
      %21 = arith.subf %20, %19 : vector<16x128xf32>
      %22 = math.exp %21 : vector<16x128xf32>
      %23 = arith.mulf %16, %18 : vector<16x128xf32>
      %cst_10 = arith.constant 0.000000e+00 : f32
      %24 = vector.broadcast %cst_10 : f32 to vector<16x128xf32>
      %25 = arith.maximumf %16, %24 : vector<16x128xf32>
      %26 = arith.subf %23, %25 : vector<16x128xf32>
      %27 = math.log1p %22 : vector<16x128xf32>
      %28 = arith.subf %27, %26 : vector<16x128xf32>
      %cst_11 = arith.constant 0.000000e+00 : f32
      %29 = vector.broadcast %cst_11 : f32 to vector<16x128xf32>
      %30 = arith.subf %29, %28 : vector<16x128xf32>
      %31 = math.exp %30 : vector<16x128xf32>
      %cst_12 = arith.constant 1.000000e+00 : f32
      %32 = vector.broadcast %cst_12 : f32 to vector<16x128xf32>
      %33 = arith.subf %32, %31 : vector<16x128xf32>
      %34 = arith.mulf %33, %33 : vector<16x128xf32>
      %cst_13 = arith.constant 0.000000e+00 : f32
      %35 = vector.broadcast %cst_13 : f32 to vector<16x128xf32>
      %36 = arith.mulf %18, %35 : vector<16x128xf32>
      %cst_14 = arith.constant 5.000000e-01 : f32
      %37 = vector.broadcast %cst_14 : f32 to vector<16x128xf32>
      %38 = arith.addf %37, %36 : vector<16x128xf32>
      %39 = arith.mulf %34, %28 : vector<16x128xf32>
      %40 = arith.mulf %38, %39 : vector<16x128xf32>
      %c0_15 = arith.constant 0 : index
      %c0_16 = arith.constant 0 : index
      %41 = vector.load %arg5[%c0_15, %c0_16] : memref<8x128xf32, #tpu.memory_space<vmem>>, vector<8x128xf32>
      %42 = vector.shape_cast %40 : vector<16x128xf32> to vector<2x8x128xf32>
      %cst_17 = arith.constant dense<0.000000e+00> : vector<8x128xf32>
      %43 = vector.multi_reduction <add>, %42, %cst_17 [0] : vector<2x8x128xf32> to vector<8x128xf32>
      %44 = arith.addf %41, %43 : vector<8x128xf32>
      %c0_18 = arith.constant 0 : index
      %c0_19 = arith.constant 0 : index
      %45 = vector.load %arg5[%c0_18, %c0_19] : memref<8x128xf32, #tpu.memory_space<vmem>>, vector<8x128xf32>
      tpu.vector_store %arg5[%c0_18, %c0_19], %44 {strides = array<i32>} : memref<8x128xf32, #tpu.memory_space<vmem>>, vector<8x128xf32>,
    } else {
    }
    %true = arith.constant true
    %10 = arith.xori %7, %true : i1
    %11 = arith.extui %10 : i1 to i32
    %c0_i32_4 = arith.constant 0 : i32
    %12 = arith.cmpi ne, %11, %c0_i32_4 : i32
    scf.if %12 {
      %c0 = arith.constant 0 : index
      %c0_7 = arith.constant 0 : index
      %16 = vector.load %arg2[%c0, %c0_7] : memref<16x128xf32, #tpu.memory_space<vmem>>, vector<16x128xf32>
      %c0_8 = arith.constant 0 : index
      %c0_9 = arith.constant 0 : index
      %17 = vector.load %arg3[%c0_8, %c0_9] : memref<16x128xbf16, #tpu.memory_space<vmem>>, vector<16x128xbf16>
      %18 = arith.extf %17 : vector<16x128xbf16> to vector<16x128xf32>
      %19 = math.absf %16 : vector<16x128xf32>
      %cst = arith.constant 0.000000e+00 : f32
      %20 = vector.broadcast %cst : f32 to vector<16x128xf32>
      %21 = arith.subf %20, %19 : vector<16x128xf32>
      %22 = math.exp %21 : vector<16x128xf32>
      %23 = arith.mulf %16, %18 : vector<16x128xf32>
      %cst_10 = arith.constant 0.000000e+00 : f32
      %24 = vector.broadcast %cst_10 : f32 to vector<16x128xf32>
      %25 = arith.maximumf %16, %24 : vector<16x128xf32>
      %26 = arith.subf %23, %25 : vector<16x128xf32>
      %27 = math.log1p %22 : vector<16x128xf32>
      %28 = arith.subf %27, %26 : vector<16x128xf32>
      %cst_11 = arith.constant 0.000000e+00 : f32
      %29 = vector.broadcast %cst_11 : f32 to vector<16x128xf32>
      %30 = arith.subf %29, %28 : vector<16x128xf32>
      %31 = math.exp %30 : vector<16x128xf32>
      %cst_12 = arith.constant 1.000000e+00 : f32
      %32 = vector.broadcast %cst_12 : f32 to vector<16x128xf32>
      %33 = arith.subf %32, %31 : vector<16x128xf32>
      %34 = arith.mulf %33, %33 : vector<16x128xf32>
      %cst_13 = arith.constant 0.000000e+00 : f32
      %35 = vector.broadcast %cst_13 : f32 to vector<16x128xf32>
      %36 = arith.mulf %18, %35 : vector<16x128xf32>
      %cst_14 = arith.constant 5.000000e-01 : f32
      %37 = vector.broadcast %cst_14 : f32 to vector<16x128xf32>
      %38 = arith.addf %37, %36 : vector<16x128xf32>
      %39 = arith.mulf %34, %28 : vector<16x128xf32>
      %40 = arith.mulf %38, %39 : vector<16x128xf32>
      %c0_i32_15 = arith.constant 0 : i32
      %41 = arith.addi %5, %c0_i32_15 : i32
      %42 = tpu.iota {dimensions = array<i32: 0>} : vector<16x128xi32>
      %43 = vector.broadcast %41 : i32 to vector<16x128xi32>
      %44 = arith.addi %43, %42 : vector<16x128xi32>
      %c16_i32_16 = arith.constant 16 : i32
      %45 = vector.broadcast %c16_i32_16 : i32 to vector<16x128xi32>
      %46 = arith.cmpi slt, %44, %45 : vector<16x128xi32>
      %cst_17 = arith.constant 0.000000e+00 : f32
      %47 = vector.broadcast %cst_17 : f32 to vector<16x128xf32>
      %48 = arith.select %46, %40, %47 : vector<16x128xi1>, vector<16x128xf32>
      %c0_18 = arith.constant 0 : index
      %c0_19 = arith.constant 0 : index
      %49 = vector.load %arg5[%c0_18, %c0_19] : memref<8x128xf32, #tpu.memory_space<vmem>>, vector<8x128xf32>
      %50 = vector.shape_cast %48 : vector<16x128xf32> to vector<2x8x128xf32>
      %cst_20 = arith.constant dense<0.000000e+00> : vector<8x128xf32>
      %51 = vector.multi_reduction <add>, %50, %cst_20 [0] : vector<2x8x128xf32> to vector<8x128xf32>
      %52 = arith.addf %49, %51 : vector<8x128xf32>
      %c0_21 = arith.constant 0 : index
      %c0_22 = arith.constant 0 : index
      %53 = vector.load %arg5[%c0_21, %c0_22] : memref<8x128xf32, #tpu.memory_space<vmem>>, vector<8x128xf32>
      tpu.vector_store %arg5[%c0_21, %c0_22], %52 {strides = array<i32>} : memref<8x128xf32, #tpu.memory_space<vmem>>, vector<8x128xf32>,
    } else {
    }
    %c0_i32_5 = arith.constant 0 : i32
    %13 = arith.cmpi eq, %arg1, %c0_i32_5 : i32
    %14 = arith.extui %13 : i1 to i32
    %c0_i32_6 = arith.constant 0 : i32
    %15 = arith.cmpi ne, %14, %c0_i32_6 : i32
    scf.if %15 {
      %c0 = arith.constant 0 : index
      %c0_7 = arith.constant 0 : index
      %16 = vector.load %arg5[%c0, %c0_7] : memref<8x128xf32, #tpu.memory_space<vmem>>, vector<8x128xf32>
      %17 = vector.shape_cast %16 : vector<8x128xf32> to vector<1x8x128xf32>
      %cst = arith.constant dense<0.000000e+00> : vector<1xf32>
      %18 = vector.multi_reduction <add>, %17, %cst [1, 2] : vector<1x8x128xf32> to vector<1xf32>
      %19 = vector.shape_cast %18 : vector<1xf32> to vector<1x1x1xf32>
      %20 = vector.extract %19[0, 0, 0] : f32 from vector<1x1x1xf32>
      %c0_8 = arith.constant 0 : index
      %c0_9 = arith.constant 0 : index
      %21 = memref.load %arg4[%c0_8, %c0_9] : memref<1x1xf32, #tpu.memory_space<smem>>
      memref.store %20, %arg4[%c0_8, %c0_9] : memref<1x1xf32, #tpu.memory_space<smem>>
    } else {
    }
    return
  }
  func.func @transform_0(%arg0: i32, %arg1: i32) -> (i32, i32) {
    %c1_i32 = arith.constant 1 : i32
    %0 = arith.muli %arg0, %c1_i32 : i32
    %1 = arith.addi %0, %arg1 : i32
    %c0_i32 = arith.constant 0 : i32
    %2 = arith.minsi %1, %c0_i32 : i32
    %c0_i32_0 = arith.constant 0 : i32
    %c0_i32_1 = arith.constant 0 : i32
    return %2, %c0_i32_0 : i32, i32
  }
  func.func @transform_1(%arg0: i32, %arg1: i32) -> (i32, i32) {
    %c1_i32 = arith.constant 1 : i32
    %0 = arith.muli %arg0, %c1_i32 : i32
    %1 = arith.addi %0, %arg1 : i32
    %c0_i32 = arith.constant 0 : i32
    %2 = arith.minsi %1, %c0_i32 : i32
    %c0_i32_0 = arith.constant 0 : i32
    %c0_i32_1 = arith.constant 0 : i32
    return %2, %c0_i32_0 : i32, i32
  }
  func.func @transform_2(%arg0: i32, %arg1: i32) -> (i32, i32) {
    %c0_i32 = arith.constant 0 : i32
    %c0_i32_0 = arith.constant 0 : i32
    return %arg0, %c0_i32 : i32, i32
  }
}

</mosaic_0001>

<bundles_post_ra>
// kernel: tpu_custom_call.1
= control target key start
LH: loop header
LB: loop body
LE: loop exit
PB: predicated region body
PF: predicated region fallthrough
CT: control target
= control target key end

     0   :  { %7 = vsyncpa [#allocation4], 0  ;;  %s354_s0 = inlined_call_operand.hbm [shape: f32[16,128], index: 0, kind: input, shape index: {}]   ;;  %s355_s1 = inlined_call_operand.hbm [shape: bf16[16,128], index: 1, kind: input, shape index: {}]   ;;  %s356_s2 = inlined_call_operand.hbm [shape: f32[1,1], index: 2, kind: output, shape index: {}]  }
   0x1   :  { %8 = vsyncpa [#allocation7], 0 }
   0x2   :  { %9 = vsyncpa [#allocation5], 0  ;;  %s323_s9 = smov [#allocation3]  }
   0x3   :  { %s21_s10 = sshll.u32 %s323_s9, 4  ;;  %s22_s10 = int_to_ptr.vmem [resolvable:$true] %s21_s10 }
   0x4   :  { %s277_s11 = scalar_lea.vmem %s22_s10, 256  ;;  %p282_p1 = scmp.lt.s32.totalorder %s22_s10, %s22_s10 }
   0x5   :  { %p278_p0 = scmp.ne.s32.totalorder %s22_s10, %s277_s11  ;;  %p283_p2 = scmp.lt.s32.totalorder %s277_s11, %s277_s11 }
   0x7   :  { %p284_p3 = por %p283_p2, %p282_p1 }
   0x9   :  { %p285_p4 = pnand %p284_p3, %p278_p0 }
   0xb   :  { %288 = shalt.err (!%p285_p4)
}
   0xc   :  { %s324_s12 = smov 128   ;;  %s325_s13 = smov 8  }
   0xd   :  { %27 = dma.hbm_to_vmem [thread:$0]  %s354_s0, 256, %s22_s10, [#allocation4], %s324_s12, %s324_s12, %s325_s13  }
   0xe   :  { %s326_s16 = smov [#allocation6]  }
   0xf   :  { %s39_s17 = sshll.u32 %s326_s16, 4  ;;  %s40_s17 = int_to_ptr.vmem [resolvable:$true] %s39_s17 }
  0x10   :  { %s297_s18 = scalar_lea.vmem %s40_s17, 128  ;;  %p302_p6 = scmp.lt.s32.totalorder %s40_s17, %s40_s17 }
  0x11   :  { %p298_p5 = scmp.ne.s32.totalorder %s40_s17, %s297_s18  ;;  %p303_p7 = scmp.lt.s32.totalorder %s297_s18, %s297_s18 }
  0x13   :  { %p304_p8 = por %p303_p7, %p302_p6 }
  0x15   :  { %p305_p9 = pnand %p304_p8, %p298_p5 }
  0x17   :  { %308 = shalt.err (!%p305_p9)
}
  0x18   :  { %s327_s19 = smov 64   ;;  %s328_s20 = smov 4  }
  0x19   :  { %45 = dma.hbm_to_vmem [thread:$0]  %s355_s1, 128, %s40_s17, [#allocation7], %s327_s19, %s327_s19, %s328_s20  }
  0x1a   :  { %317 = dma.done.wait [#allocation4], 256  }
  0x1b   :  { %318 = vsyncadd [#allocation4], 4294967040 }
  0x1c   :  { %319 = dma.done.wait [#allocation7], 128  }
  0x1d   :  { %320 = vsyncadd [#allocation7], 4294967168  ;;  %v72_v0 = vld [vmem:[#allocation3] sm:$0xff]  ;;  %v73_v1 = vld [vmem:[#allocation3 + $0x8] sm:$0xff]  ;;  %s329_s1 = smov [#allocation8]  }
  0x1e   :  { %v78_v2 = vand.u32 2147483647, %v72_v0  ;;  %v79_v3 = vand.u32 2147483647, %v73_v1  ;;  %v245_v12 = vld [vmem:[#allocation6] sm:$0xff]   ;;  %v88_v19 = vmax.f32 %v72_v0, 0.0 }
  0x1f   :  { %v246_v14 = vunpack.c.l.bf16 %v245_v12  ;;  %v247_v16 = vunpack.c.h.bf16 %v245_v12  ;;  %v89_v23 = vmax.f32 %v73_v1, 0.0 }
  0x20   :  { %v80_v4 = vsub.f32 0.0, %v78_v2  ;;  %v81_v5 = vsub.f32 0.0, %v79_v3 }
  0x21   :  { %v86_v18 = vmul.f32 %v246_v14, %v72_v0  ;;  %v87_v22 = vmul.f32 %v247_v16, %v73_v1  ;;  %v122_v41 = vmul.f32 0.0, %v246_v14  ;;  %v123_v43 = vmul.f32 0.0, %v247_v16 }
  0x22   :  { %v82_v6 = vmul.f32 1.442695, %v80_v4  ;;  %v84_v7 = vmul.f32 1.442695, %v81_v5 }
  0x23   :  { %v90_v27 = vsub.f32 %v86_v18, %v88_v19  ;;  %v91_v30 = vsub.f32 %v87_v22, %v89_v23  ;;  %v124_v48 = vadd.f32 0.5, %v122_v41  ;;  %v125_v50 = vadd.f32 0.5, %v123_v43 }
  0x24   :  { %257 = vpow2.f32 %v82_v6 }
  0x25   :  { %259 = vpow2.f32 %v84_v7 }
  0x31   :  { %v258_v8 = vpop.eup %257 }
  0x32   :  { %v260_v9 = vpop.eup %259  ;;  %v92_v10 = vadd.f32 1.0, %v258_v8  ;;  %v95_v13 = vmul.f32 -0.5, %v258_v8  ;;  %v98_v20 = vand.u32 2147483647, %v258_v8 }
  0x33   :  { %v101_v11 = vadd.f32 1.0, %v260_v9  ;;  %v104_v15 = vmul.f32 -0.5, %v260_v9  ;;  %v107_v24 = vand.u32 2147483647, %v260_v9 }
  0x34   :  { %261 = vlog2.f32 %v92_v10  ;;  %v96_v17 = vadd.f32 1.0, %v95_v13  ;;  %vm99_vm0 = vcmp.lt.f32.partialorder %v98_v20, 0.0004427343 }
  0x35   :  { %263 = vlog2.f32 %v101_v11  ;;  %v105_v21 = vadd.f32 1.0, %v104_v15  ;;  %vm108_vm1 = vcmp.lt.f32.partialorder %v107_v24, 0.0004427343 }
  0x36   :  { %v97_v25 = vmul.f32 %v258_v8, %v96_v17 }
  0x37   :  { %v106_v28 = vmul.f32 %v260_v9, %v105_v21 }
  0x41   :  { %v262_v26 = vpop.eup %261 }
  0x42   :  { %v264_v29 = vpop.eup %263  ;;  %v94_v31 = vmul.f32 0.6931472, %v262_v26 }
  0x43   :  { %v103_v32 = vmul.f32 0.6931472, %v264_v29 }
  0x44   :  { %v100_v33 = vsel %vm99_vm0, %v97_v25, %v94_v31 }
  0x45   :  { %v109_v34 = vsel %vm108_vm1, %v106_v28, %v103_v32  ;;  %v110_v35 = vsub.f32 %v100_v33, %v90_v27 }
  0x46   :  { %v111_v36 = vsub.f32 %v109_v34, %v91_v30 }
  0x47   :  { %v112_v37 = vsub.f32 0.0, %v110_v35 }
  0x48   :  { %v113_v38 = vsub.f32 0.0, %v111_v36 }
  0x49   :  { %v114_v39 = vmul.f32 1.442695, %v112_v37 }
  0x4a   :  { %v116_v40 = vmul.f32 1.442695, %v113_v38 }
  0x4b   :  { %265 = vpow2.f32 %v114_v39 }
  0x4c   :  { %267 = vpow2.f32 %v116_v40 }
  0x58   :  { %v266_v42 = vpop.eup %265 }
  0x59   :  { %v268_v44 = vpop.eup %267  ;;  %v118_v45 = vsub.f32 1.0, %v266_v42 }
  0x5a   :  { %v119_v46 = vsub.f32 1.0, %v268_v44 }
  0x5b   :  { %v120_v47 = vmul.f32 %v118_v45, %v118_v45 }
  0x5c   :  { %v121_v49 = vmul.f32 %v119_v46, %v119_v46 }
  0x5d   :  { %v126_v51 = vmul.f32 %v120_v47, %v110_v35 }
  0x5e   :  { %v127_v52 = vmul.f32 %v121_v49, %v111_v36 }
  0x5f   :  { %v128_v53 = vmul.f32 %v126_v51, %v124_v48 }
  0x60   :  { %v129_v54 = vmul.f32 %v127_v52, %v125_v50 }
  0x62   :  { %v131_v55 = vadd.f32 %v129_v54, %v128_v53 }
  0x64   :  { %214 = vadd.xlane.f32.xlu0 %v131_v55 }
  0xed   :  { %v215_v56 = vpop.xlane.xlu0 %214 }
  0xee   :  { %v216_v57 = vrot.slane %v215_v56, 4 }
  0xf0   :  { %v217_v58 = vadd.f32 %v216_v57, %v215_v56 }
  0xf2   :  { %v218_v59 = vrot.slane %v217_v58, 2 }
  0xf4   :  { %v219_v60 = vadd.f32 %v218_v59, %v217_v58 }
  0xf6   :  { %v220_v61 = vrot.slane %v219_v60, 1 }
  0xf8   :  { %v221_v62 = vadd.f32 %v220_v61, %v219_v60 }
  0xfa   :  { %248 = vpush %v221_v62 }
 0x12b   :  { %s249_s0 = spop %248 }
 0x12c   :  { %224 = sst [smem:[#allocation8]] %s249_s0 }
 0x12d   :  { %232 = dma.smem_to_hbm %s329_s1, 16, %s356_s2, [#allocation5]  }
 0x12e   :  { %321 = dma.done.wait [#allocation5], 16  }
 0x12f   :  { %322 = vsyncadd [#allocation5], 4294967280 }
 0x130   :  { %236 = sfence }
 0x131   :  { %237 = vsyncpa [#allocation4], 1 }
 0x132   :  { %238 = vsyncpa [#allocation7], 1 }
 0x133   :  { %239 = vsyncpa [#allocation5], 1 }

</bundles_post_ra>
